<compile_context>
chip_gen: v6e
topology: v6e:2x2x1
jax: 0.10.0
libtpu: 0.0.40
codegen_flags: <defaults>
</compile_context>

<pallas_src>
import functools

import jax
import jax.numpy as jnp
from jax.experimental import pallas as pl
from jax.experimental.pallas import tpu as pltpu


def _round_up(x, m):
    return (x + m - 1) // m * m


def dropout_mask(key, shape, rate):
    """Pre-scaled inverted-dropout keep mask (matches F.dropout training=True)."""
    rate = float(min(max(rate, 0.0), 1.0))
    if rate >= 1.0:          # p == 1: everything dropped (avoid 1/(1-p) blowup)
        return jnp.zeros(shape, jnp.float32)
    keep = jax.random.bernoulli(key, 1.0 - rate, shape)
    return keep.astype(jnp.float32) * jnp.float32(1.0 / (1.0 - rate))


def _linear_kernel(x_ref, w_ref, b_ref, *rest, act, with_dropout):
    """Fused tiled matmul: acc += x@W over K tiles; epilogue adds bias,
    applies the (pre-scaled) dropout mask and the activation."""
    if with_dropout:
        m_ref, o_ref, acc_ref = rest
    else:
        o_ref, acc_ref = rest
        m_ref = None

    k = pl.program_id(2)

    @pl.when(k == 0)
    def _init():
        acc_ref[...] = jnp.zeros_like(acc_ref)

    # bf16 x bf16 -> f32 accumulate on the MXU.
    acc_ref[...] += jnp.dot(x_ref[...], w_ref[...],
                            preferred_element_type=jnp.float32)

    @pl.when(k == pl.num_programs(2) - 1)
    def _finalize():
        h = acc_ref[...] + b_ref[...].astype(jnp.float32)   # broadcast (1, tn)
        if with_dropout:
            h = h * m_ref[...]                               # inverted dropout
        o_ref[...] = act(h).astype(o_ref.dtype)


def linear_forward(x, weight, bias, *, act=jax.nn.relu, dropout_rate=0.0,
                   training=False, rng_key=None, bm=256, bk=512, bn=512):
    """Fused linear + dropout + activation.

    x:      (M, K) float32
    weight: (N, K) float32  -- torch nn.Linear layout (out_features, in_features)
    bias:   (N,)   float32 or None (use_bias=False)
    """
    M, K = x.shape
    N, Kw = weight.shape
    assert K == Kw, (K, Kw)
    out_dtype = x.dtype

    # ---- tile sizes: lane-dense (K/N tiles multiples of 128, M tile of 8) ----
    tm = min(bm, _round_up(M, 8))
    tk = min(bk, _round_up(K, 128))
    tn = min(bn, _round_up(N, 128))
    Mp, Kp, Np = _round_up(M, tm), _round_up(K, tk), _round_up(N, tn)

    # ---- zero-pad to tile multiples, cast matmul operands to bf16 ----
    xp = jnp.pad(x, ((0, Mp - M), (0, Kp - K))).astype(jnp.bfloat16)
    wt = jnp.pad(weight.T, ((0, Kp - K), (0, Np - N))).astype(jnp.bfloat16)
    if bias is None:
        bias = jnp.zeros((N,), jnp.float32)
    bp = jnp.pad(bias.astype(jnp.float32), (0, Np - N)).reshape(1, Np)

    rate = float(min(max(dropout_rate, 0.0), 1.0))
    with_dropout = bool(training) and rate > 0.0

    inputs = [xp, wt, bp]
    in_specs = [
        pl.BlockSpec((tm, tk), lambda i, j, k: (i, k)),
        pl.BlockSpec((tk, tn), lambda i, j, k: (k, j)),
        pl.BlockSpec((1, tn), lambda i, j, k: (0, j)),
    ]
    if with_dropout:
        if rng_key is None:
            rng_key = jax.random.PRNGKey(0)
        mask = dropout_mask(rng_key, (M, N), rate)
        mask = jnp.pad(mask, ((0, Mp - M), (0, Np - N)))
        inputs.append(mask)
        in_specs.append(pl.BlockSpec((tm, tn), lambda i, j, k: (i, j)))

    kernel = functools.partial(_linear_kernel, act=act,
                               with_dropout=with_dropout)

    out_item = jnp.dtype(out_dtype).itemsize
    bytes_accessed = int((Mp * Kp + Kp * Np) * 2 + Np * 4
                         + Mp * Np * out_item
                         + (Mp * Np * 4 if with_dropout else 0))

    out = pl.pallas_call(
        kernel,
        out_shape=jax.ShapeDtypeStruct((Mp, Np), out_dtype),
        grid_spec=pltpu.PrefetchScalarGridSpec(
            num_scalar_prefetch=0,
            grid=(Mp // tm, Np // tn, Kp // tk),
            in_specs=in_specs,
            out_specs=pl.BlockSpec((tm, tn), lambda i, j, k: (i, j)),
            scratch_shapes=[pltpu.VMEM((tm, tn), jnp.float32)],
        ),
        compiler_params=pltpu.CompilerParams(
            dimension_semantics=("parallel", "parallel", "arbitrary")),
        cost_estimate=pl.CostEstimate(
            flops=2 * Mp * Np * Kp, transcendentals=0,
            bytes_accessed=bytes_accessed),
    )(*inputs)

    return out[:M, :N]


if __name__ == "__main__":
    act = jax.nn.relu
    dropout = 0.5

    key = jax.random.PRNGKey(0)
    k1, k2, k3, k4, k5, k6, kd = jax.random.split(key, 7)

    # ---- Case 1: tile-aligned shapes, multi-tile grid (exercises the K
    #      accumulator and the parallel M/N grid axes). ----
    M1, K1, N1 = 32, 512, 256
    bound1 = 1.0 / (K1 ** 0.5)
    x1 = jax.random.normal(k1, (M1, K1), dtype=jnp.float32)
    w1 = jax.random.uniform(k2, (N1, K1), minval=-bound1, maxval=bound1,
                            dtype=jnp.float32)
    b1 = jax.random.uniform(k3, (N1,), minval=-bound1, maxval=bound1,
                            dtype=jnp.float32)

    out1 = jax.block_until_ready(
        linear_forward(x1, w1, b1, act=act, dropout_rate=dropout,
                       training=False, bm=32, bk=128, bn=128))
    ref1 = act(jnp.dot(x1.astype(jnp.bfloat16), w1.T.astype(jnp.bfloat16),
                       preferred_element_type=jnp.float32) + b1)
    assert out1.shape == (M1, N1)
    assert jnp.allclose(out1, ref1, atol=2e-3, rtol=2e-3)

    # ---- Case 2: small / unaligned shapes (exercises K and N zero-padding
    #      up to lane-dense tiles). ----
    M2, K2, N2 = 8, 32, 64
    bound2 = 1.0 / (K2 ** 0.5)
    x2 = jax.random.normal(k4, (M2, K2), dtype=jnp.float32)
    w2 = jax.random.uniform(k5, (N2, K2), minval=-bound2, maxval=bound2,
                            dtype=jnp.float32)
    b2 = jax.random.uniform(k6, (N2,), minval=-bound2, maxval=bound2,
                            dtype=jnp.float32)

    out2 = jax.block_until_ready(
        linear_forward(x2, w2, b2, act=act, dropout_rate=dropout,
                       training=False))
    ref2 = act(jnp.dot(x2.astype(jnp.bfloat16), w2.T.astype(jnp.bfloat16),
                       preferred_element_type=jnp.float32) + b2)
    assert out2.shape == (M2, N2)
    assert jnp.allclose(out2, ref2, atol=2e-3, rtol=2e-3)

    # ---- Case 3: training-mode dropout (same host-generated mask is used
    #      for the reference). ----
    out3 = jax.block_until_ready(
        linear_forward(x2, w2, b2, act=act, dropout_rate=dropout,
                       training=True, rng_key=kd))
    mask3 = dropout_mask(kd, (M2, N2), dropout)
    ref3 = act((jnp.dot(x2.astype(jnp.bfloat16), w2.T.astype(jnp.bfloat16),
                        preferred_element_type=jnp.float32) + b2) * mask3)
    assert out3.shape == (M2, N2)
    assert jnp.allclose(out3, ref3, atol=2e-3, rtol=2e-3)

    print("KERNEL_OK")
</pallas_src>

<mosaic_0001>
module attributes {stable_mosaic.version = 11 : i64} {
  func.func @_linear_kernel(%arg0: i32, %arg1: i32, %arg2: i32, %arg3: memref<32x128xbf16, #tpu.memory_space<vmem>>, %arg4: memref<128x128xbf16, #tpu.memory_space<vmem>>, %arg5: memref<1x128xf32, #tpu.memory_space<vmem>>, %arg6: memref<32x128xf32, #tpu.memory_space<vmem>>, %arg7: memref<32x128xf32, #tpu.memory_space<vmem>>) attributes {dimension_semantics = [#tpu.dimension_semantics<parallel>, #tpu.dimension_semantics<parallel>, #tpu.dimension_semantics<arbitrary>], iteration_bounds = array<i64: 1, 2, 4>, scalar_prefetch = 0 : i64, scratch_operands = 1 : i64, tpu.core_type = #tpu.core_type<tc>, window_params = [{transform_indices = @transform_0, window_bounds = array<i64: 32, 128>}, {transform_indices = @transform_1, window_bounds = array<i64: 128, 128>}, {transform_indices = @transform_2, window_bounds = array<i64: 1, 128>}, {transform_indices = @transform_3, window_bounds = array<i64: 32, 128>}]} {
    %c0_i32 = arith.constant 0 : i32
    %0 = arith.cmpi eq, %arg2, %c0_i32 : i32
    %1 = arith.extui %0 : i1 to i32
    %c0_i32_0 = arith.constant 0 : i32
    %2 = arith.cmpi ne, %1, %c0_i32_0 : i32
    scf.if %2 {
      %cst_9 = arith.constant 0.000000e+00 : f32
      %12 = vector.broadcast %cst_9 : f32 to vector<32x128xf32>
      %c0_10 = arith.constant 0 : index
      %c0_11 = arith.constant 0 : index
      %13 = vector.load %arg7[%c0_10, %c0_11] : memref<32x128xf32, #tpu.memory_space<vmem>>, vector<32x128xf32>
      tpu.vector_store %arg7[%c0_10, %c0_11], %12 {strides = array<i32>} : memref<32x128xf32, #tpu.memory_space<vmem>>, vector<32x128xf32>,
    } else {
    }
    %c0 = arith.constant 0 : index
    %c0_1 = arith.constant 0 : index
    %3 = vector.load %arg7[%c0, %c0_1] : memref<32x128xf32, #tpu.memory_space<vmem>>, vector<32x128xf32>
    %c0_2 = arith.constant 0 : index
    %c0_3 = arith.constant 0 : index
    %4 = vector.load %arg3[%c0_2, %c0_3] : memref<32x128xbf16, #tpu.memory_space<vmem>>, vector<32x128xbf16>
    %c0_4 = arith.constant 0 : index
    %c0_5 = arith.constant 0 : index
    %5 = vector.load %arg4[%c0_4, %c0_5] : memref<128x128xbf16, #tpu.memory_space<vmem>>, vector<128x128xbf16>
    %cst = arith.constant dense<0.000000e+00> : vector<32x128xf32>
    %6 = tpu.matmul %4, %5, %cst {dimension_numbers = #tpu.dot_dimension_numbers<[1], [0], [0], [1], [0, 0, 1, 1], [], []>} : vector<32x128xbf16>, vector<128x128xbf16>, vector<32x128xf32> -> vector<32x128xf32>
    %7 = arith.addf %3, %6 : vector<32x128xf32>
    %c0_6 = arith.constant 0 : index
    %c0_7 = arith.constant 0 : index
    %8 = vector.load %arg7[%c0_6, %c0_7] : memref<32x128xf32, #tpu.memory_space<vmem>>, vector<32x128xf32>
    tpu.vector_store %arg7[%c0_6, %c0_7], %7 {strides = array<i32>} : memref<32x128xf32, #tpu.memory_space<vmem>>, vector<32x128xf32>,
    %c3_i32 = arith.constant 3 : i32
    %9 = arith.cmpi eq, %arg2, %c3_i32 : i32
    %10 = arith.extui %9 : i1 to i32
    %c0_i32_8 = arith.constant 0 : i32
    %11 = arith.cmpi ne, %10, %c0_i32_8 : i32
    scf.if %11 {
      %c0_9 = arith.constant 0 : index
      %c0_10 = arith.constant 0 : index
      %12 = vector.load %arg7[%c0_9, %c0_10] : memref<32x128xf32, #tpu.memory_space<vmem>>, vector<32x128xf32>
      %c0_11 = arith.constant 0 : index
      %c0_12 = arith.constant 0 : index
      %13 = vector.load %arg5[%c0_11, %c0_12] : memref<1x128xf32, #tpu.memory_space<vmem>>, vector<1x128xf32>
      %14 = vector.broadcast %13 : vector<1x128xf32> to vector<32x128xf32>
      %15 = arith.addf %12, %14 : vector<32x128xf32>
      %cst_13 = arith.constant 0.000000e+00 : f32
      %16 = vector.broadcast %cst_13 : f32 to vector<32x128xf32>
      %17 = arith.maximumf %15, %16 : vector<32x128xf32>
      %c0_14 = arith.constant 0 : index
      %c0_15 = arith.constant 0 : index
      %18 = vector.load %arg6[%c0_14, %c0_15] : memref<32x128xf32, #tpu.memory_space<vmem>>, vector<32x128xf32>
      tpu.vector_store %arg6[%c0_14, %c0_15], %17 {strides = array<i32>} : memref<32x128xf32, #tpu.memory_space<vmem>>, vector<32x128xf32>,
    } else {
    }
    return
  }
  func.func @transform_0(%arg0: i32, %arg1: i32, %arg2: i32) -> (i32, i32) {
    %c0_i32 = arith.constant 0 : i32
    return %arg0, %arg2 : i32, i32
  }
  func.func @transform_1(%arg0: i32, %arg1: i32, %arg2: i32) -> (i32, i32) {
    %c0_i32 = arith.constant 0 : i32
    return %arg2, %arg1 : i32, i32
  }
  func.func @transform_2(%arg0: i32, %arg1: i32, %arg2: i32) -> (i32, i32) {
    %c0_i32 = arith.constant 0 : i32
    %c0_i32_0 = arith.constant 0 : i32
    return %c0_i32, %arg1 : i32, i32
  }
  func.func @transform_3(%arg0: i32, %arg1: i32, %arg2: i32) -> (i32, i32) {
    %c0_i32 = arith.constant 0 : i32
    return %arg0, %arg1 : i32, i32
  }
}

</mosaic_0001>

<bundles_post_ra>
// kernel: tpu_custom_call.1
= control target key start
LH: loop header
LB: loop body
LE: loop exit
PB: predicated region body
PF: predicated region fallthrough
CT: control target
= control target key end

     0   :  { %s1385_s0 = inlined_call_operand.hbm [shape: bf16[32,512], index: 0, kind: input, shape index: {}]   ;;  %s1386_s1 = inlined_call_operand.hbm [shape: bf16[512,256], index: 1, kind: input, shape index: {}]   ;;  %s1387_s2 = inlined_call_operand.vmem [shape: f32[1,256], index: 2, kind: input, shape index: {}]   ;;  %s1388_s3 = inlined_call_operand.hbm [shape: f32[32,256], index: 3, kind: output, shape index: {}]  }
   0x1   :  { %1398 = sst [smem:[#allocation18_spill]] %s1385_s0 }
   0x2   :  { %1399 = sst [smem:[#allocation19_spill]] %s1387_s2 }
   0x3   :  { %1400 = sst [smem:[#allocation20_spill]] %s1388_s3 }
   0x4   :  { %8 = vsyncpa [#allocation4], 0 }
   0x5   :  { %10 = vsyncpa [#allocation4 + $0x1], 0 }
   0x6   :  { %11 = vsyncpa [#allocation7], 0 }
   0x7   :  { %13 = vsyncpa [#allocation7 + $0x1], 0 }
   0x8   :  { %14 = vsyncpa [#allocation5], 0 }
   0x9   :  { %16 = vsyncpa [#allocation5 + $0x1], 0  ;;  %s1041_s12 = smov 0   ;;  %s1043_s13 = smov 0  }
   0xa   :  { %s1045_s14 = smov 0   ;;  %s1047_s15 = smov 0  }
   0xb   :  { %s1049_s16 = smov 0   ;;  %s1051_s17 = smov 0  }
   0xc   :  { %s1053_s18 = smov 0   ;;  %s1055_s19 = smov 0  }
   0xd   :  { %s1057_s20 = smov 0   ;;  %s1059_s21 = smov 0  }
   0xe   :  { %s1061_s22 = smov 0   ;;  %s1063_s23 = smov 0  }
   0xf   :  { %s1065_s24 = smov 0   ;;  %s1067_s25 = smov 0  }
  0x10 LB: > { %1401 = sst [smem:[#allocation12_spill]] %s988_s20  ;;  %s593_s26 = sadd.s32 4294967295, %s1008_s25   ;;  %s1008_s25 = sphi %s1067_s25, %s22_s25   ;;  %s1004_s24 = sphi %s1065_s24, %s1446_s24   ;;  %s1000_s23 = sphi %s1063_s23, %s1434_s23   ;;  %s996_s22 = sphi %s1061_s22, %s1445_s22   ;;  %s992_s21 = sphi %s1059_s21, %s1433_s21   ;;  %s988_s20 = sphi %s1057_s20, %s1432_s20   ;;  %s984_s19 = sphi %s1055_s19, %s1444_s19   ;;  %s980_s18 = sphi %s1053_s18, %s1443_s18   ;;  %s976_s17 = sphi %s1051_s17, %s1442_s17   ;;  %s972_s16 = sphi %s1049_s16, %s1441_s16   ;;  %s968_s15 = sphi %s1047_s15, %s1440_s15   ;;  %s964_s14 = sphi %s1045_s14, %s1439_s14   ;;  %s960_s13 = sphi %s1043_s13, %s1438_s13   ;;  %s956_s12 = sphi %s1041_s12, %s1437_s12  }
  0x11   : > { %1402 = sst [smem:[#allocation13_spill]] %s992_s21  ;;  %s34_s27 = sadd.s32 1, %s1000_s23 }
  0x12   : > { %1403 = sst [smem:[#allocation14_spill]] %s1000_s23  ;;  %p1111_p0 = scmp.ge.s32.totalorder %s34_s27, 4 }
  0x13   : > { %s50_s29 = sadd.s32 1, %s988_s20  ;;  %p57_p1 = scmp.ne.s32.totalorder %s988_s20, %s984_s19 }
  0x14   : > { %p1392_p2 = scmp.eq.s32.totalorder %s1008_s25, 0  ;;  %s1448_s27 = smov (%p1111_p0, %s34_s27), 0 }
  0x15   : > { %1405 = sst [smem:[#allocation15_spill]] %s1448_s27  ;;  %p63_p4 = scmp.ne.s32.totalorder %s984_s19, %s980_s18 }
  0x16   : > { %p1125_p3 = por %p1392_p2, %p57_p1  ;;  %s1132_s4 = ssub.s32 %s1000_s23, %s1448_s27 }
  0x17   : > { %p1134_p5 = scmp.eq.s32.totalorder %s593_s26, 0  ;;  %p48_p6 = scmp.eq.s32.totalorder %s1132_s4, 0 }
  0x18   : > { %p1139_p7 = scmp.eq.s32.totalorder %s593_s26, 7  ;;  %p672_p9 = scmp.lt.s32.totalorder %s1008_s25, 8 }
  0x19   : > { %p1145_p8 = por %p1134_p5, %p63_p4  ;;  %s169_s9 = sand.u32 1, %s988_s20  }
  0x1a   : > { %s1150_s8 = scalar_select %p48_p6, %s988_s20, %s50_s29  }
  0x1b   : > { %s1409_s7 = scalar_select %p1145_p8, 1, 0 }
  0x1c   : > { %1410 = sst [smem:[#allocation16_spill]] %s1150_s8  ;;  %s597_s10 = sshll.u32 %s169_s9, 4 }
  0x1d   : > { %s598_s11 = sshll.u32 %s1000_s23, 6  ;;  %s1411_s0 = sld [smem:[#allocation18_spill]] }
  0x1e   : > { %s173_s21 = scalar_lea.vmem [#allocation3], %s597_s10  ;;  %p1162_p10 = pnand %p672_p9, %p1125_p3 }
  0x1f   : > { %s182_s26 = sshll.u32 %s173_s21, 4  ;;  %s170_s29 = scalar_lea.sflag [#allocation4], %s169_s9  ;;  %s183_s26 = int_to_ptr.vmem [resolvable:$true] %s182_s26 }
  0x20   : > { %p806_p11 = pneg %p1162_p10  ;;  %s817_s8 = scalar_lea.vmem %s183_s26, 256 }
  0x21   : > { %p818_p12 = scmp.ne.s32.totalorder %s183_s26, %s817_s8  ;;  %s1010_s20 = smov [#allocation3]  }
  0x22   : > { %s822_s27 = sshll.u32 %s1010_s20, 4  ;;  %s823_s27 = int_to_ptr.vmem [resolvable:$false] %s822_s27 }
  0x23   : > { %s181_s3 = scalar_lea.hbm %s1411_s0, %s598_s11  ;;  %p820_p13 = pnand %p818_p12, %p806_p11 }
  0x24   : > { %s824_s10 = scalar_lea.vmem %s823_s27, 512  ;;  %p825_p4 = scmp.lt.s32.totalorder %s183_s26, %s823_s27 }
  0x25   : > { %p821_p1 = pneg %p820_p13  ;;  %p826_p6 = scmp.lt.s32.totalorder %s824_s10, %s817_s8 }
  0x27   : > { %p827_p2 = por %p826_p6, %p825_p4 }
  0x29   : > { %p828_p8 = pnand %p827_p2, %p821_p1 }
  0x2b   : > { %831 = shalt.err (!%p828_p8)
}
  0x2c   : > { %s1011_s21 = smov 256   ;;  %s1394_s20 = smov 64  }
  0x2d   : > { %s1395_s30 = smov 4   ;;  %p603_p2 = scmp.ge.s32.totalorder %s1008_s25, 1 }
  0x2e   : > { %664 = dma.hbm_to_vmem [thread:$0]  (!%p1162_p10), %s181_s3, 256, %s183_s26, %s170_s29, %s1011_s21, %s1394_s20, %s1395_s30  }
  0x2f   : > { %p219_p3 = scmp.lt.s32.totalorder %s1008_s25, 9  ;;  %s594_s9 = sadd.s32 4294967294, %s1008_s25  }
  0x30   : > { %s37_s11 = sadd.s32 1, %s1004_s24  ;;  %s78_s18 = sadd.s32 1, %s976_s17 }
  0x31   : > { %p1174_p8 = pnand %p603_p2, %p219_p3  ;;  %s1450_s11 = smov (!%p1111_p0, %s37_s11), %s1004_s24 }
  0x32   : > { %p85_p11 = scmp.ne.s32.totalorder %s976_s17, %s972_s16  ;;  %p91_p10 = scmp.ne.s32.totalorder %s972_s16, %s968_s15 }
  0x33   : > { %p39_p12 = scmp.ge.s32.totalorder %s1450_s11, 2  ;;  %s132_s2 = sadd.s32 1, %s964_s14 }
  0x34   : > { %p1414_p13 = scmp.eq.s32.totalorder %s1008_s25, 0  ;;  %p1197_p4 = por %p91_p10, %p1134_p5 }
  0x35   : > { %s1452_s11 = smov (%p39_p12, %s1450_s11), 0  ;;  %p142_p0 = scmp.ne.s32.totalorder %s964_s14, %s960_s13 }
  0x36   : > { %p1191_p1 = por %p85_p11, %p1414_p13  ;;  %1417 = sst [smem:[#allocation17_spill]] %s1452_s11 }
  0x37   : > { %p148_p6 = scmp.ne.s32.totalorder %s960_s13, %s956_s12  ;;  %s74_s15 = ssub.s32 %s1004_s24, %s1452_s11 }
  0x38   : > { %p149_p2 = scmp.eq.s32.totalorder %s594_s9, 7  ;;  %s75_s28 = sor.u32 %s74_s15, %s1132_s4 }
  0x39   : > { %p130_p3 = scmp.eq.s32.totalorder %s74_s15, 0  ;;  %p76_p11 = scmp.eq.s32.totalorder %s75_s28, 0 }
  0x3a   : > { %p1212_p13 = por %p1139_p7, %p142_p0  ;;  %p1222_p5 = por %p149_p2, %p148_p6 }
  0x3b   : > { %s1217_s29 = scalar_select %p130_p3, %s964_s14, %s132_s2  }
  0x3c   : > { %s1220_s27 = scalar_select %p76_p11, %s976_s17, %s78_s18  }
  0x3d   : > { %s1419_s10 = scalar_select %p1222_p5, 1, 0 }
  0x3e   : > { %s192_s21 = sand.u32 1, %s976_s17   ;;  %s624_s4 = sshll.u32 %s1000_s23, 5 }
  0x3f   : > { %s599_s9 = sshll.u32 %s192_s21, 6  ;;  %s202_s20 = sadd.s32 %s1004_s24, %s624_s4 }
  0x40   : > { %s196_s30 = scalar_lea.vmem [#allocation6], %s599_s9  ;;  %s602_s28 = sshll.u32 %s202_s20, 6 }
  0x41   : > { %s205_s15 = sshll.u32 %s196_s30, 4  ;;  %s204_s11 = scalar_lea.hbm %s1386_s1, %s602_s28  ;;  %s206_s15 = int_to_ptr.vmem [resolvable:$true] %s205_s15 }
  0x42   : > { %p1236_p7 = pnand %p672_p9, %p1191_p1  ;;  %s193_s2 = scalar_lea.sflag [#allocation7], %s192_s21 }
  0x43   : > { %s845_s23 = scalar_lea.vmem %s206_s15, 1024  ;;  %s1014_s20 = smov [#allocation6]  }
  0x44   : > { %p834_p10 = pneg %p1236_p7  ;;  %p846_p12 = scmp.ne.s32.totalorder %s206_s15, %s845_s23 }
  0x45   : > { %s850_s30 = sshll.u32 %s1014_s20, 4  ;;  %s851_s30 = int_to_ptr.vmem [resolvable:$false] %s850_s30 }
  0x46   : > { %p848_p0 = pnand %p846_p12, %p834_p10  ;;  %s852_s9 = scalar_lea.vmem %s851_s30, 2048 }
  0x47   : > { %p853_p2 = scmp.lt.s32.totalorder %s206_s15, %s851_s30  ;;  %p854_p3 = scmp.lt.s32.totalorder %s852_s9, %s845_s23 }
  0x48   : > { %p849_p6 = pneg %p848_p0 }
  0x49   : > { %p855_p11 = por %p854_p3, %p853_p2 }
  0x4b   : > { %p856_p5 = pnand %p855_p11, %p849_p6 }
  0x4d   : > { %859 = shalt.err (!%p856_p5)
}
  0x4e   : > { %s1015_s0 = smov 128   ;;  %s1421_s3 = smov 4  }
  0x4f   : > { %s1422_s21 = smov 64   ;;  %223 = sbr.rel (%p1174_p8) target bundleno = 380 (0x17c), region = 32 }
  0x50   : > { %667 = dma.hbm_to_vmem [thread:$0]  (!%p1236_p7), %s204_s11, 1024, %s206_s15, %s193_s2, %s1015_s0, %s1422_s21, %s1421_s3  }
  0x51   : > { %s225_s4 = sand.u32 (!%p1174_p8), 1, %s984_s19   ;;  %p1423_p9 = scmp.ne.s32.totalorder (!%p1174_p8), %s1409_s7, 0 }
  0x52   : > { %s1249_s28 = sshll.u32 (!%p1174_p8), %s225_s4, 4  ;;  %s226_s6 = scalar_lea.sflag (!%p1174_p8), [#allocation4], %s225_s4 }
  0x53   : > { %s229_s23 = scalar_lea.vmem (!%p1174_p8), [#allocation3], %s1249_s28 }
  0x54   : > { %943 = dma.done.wait (%p1423_p9), %s226_s6, 256  }
  0x55   : > { %945 = vsyncadd (%p1423_p9), %s226_s6, 4294967040  ;;  %s234_s18 = sand.u32 1, %s972_s16  }
  0x56   : > { %s605_s11 = sshll.u32 %s234_s18, 6  ;;  %s235_s15 = scalar_lea.sflag [#allocation7], %s234_s18 }
  0x57   : > { %s1257_s8 = scalar_lea.vmem [#allocation6], %s605_s11 }
  0x58   : > { %947 = dma.done.wait (%p1197_p4), %s235_s15, 1024  }
  0x59   : > { %949 = vsyncadd (%p1197_p4), %s235_s15, 4294966272  ;;  %s266_s2 = sand.u32 1, %s960_s13   ;;  %p271_p8 = scmp.lt.s32.totalorder %s996_s22, 1 }
  0x5a   : > { %s606_s7 = sshll.u32 %s266_s2, 5  ;;  %s1424_s0 = sld [smem:[#allocation19_spill]] }
  0x5b   : > { %s1268_s20 = scalar_select %p271_p8, %s996_s22, 1 }
  0x5c   : > { %s1274_s21 = scalar_lea.vmem [#allocation8], %s606_s7  ;;  %s1425_s4 = sld [smem:[#allocation13_spill]] }
  0x60   : > { %s273_s3 = scalar_lea.vmem %s1424_s0, %s1268_s20 }
  0x62   : > { %p607_p1 = scmp.ne.s32.totalorder %s1425_s4, 0 }
  0x64   : > { %279 = sbr.rel (%p607_p1) target bundleno = 108 (0x6c), region = 44 }
  0x69   : > { %v1016_v0 = vmov 0.0  }
  0x6a   : > { %280 = vst [vmem:[#allocation2 + $0x10] sm:$0xff] %v1016_v0  ;;  %281 = vst [vmem:[#allocation2] sm:$0xff] %v1016_v0 }
  0x6b   : > { %282 = vst [vmem:[#allocation2 + $0x18] sm:$0xff] %v1016_v0  ;;  %283 = vst [vmem:[#allocation2 + $0x8] sm:$0xff] %v1016_v0 }
  0x6c PF: > { %v794_v1 = vld [vmem:[%s1257_s8 + $0x38] sm:$0xff]   ;;  %v795_v2 = vld [vmem:[%s1257_s8 + $0x30] sm:$0xff]   ;;  %v796_v3 = vld [vmem:[%s1257_s8 + $0x28] sm:$0xff]   ;;  %s1426_s26 = sld [smem:[#allocation13_spill]] }
  0x6d   : > { %635 = vmatprep.subr.bf16.mxu0 %v794_v1  ;;  %v797_v4 = vld [vmem:[%s1257_s8 + $0x20] sm:$0xff]   ;;  %v798_v6 = vld [vmem:[%s1257_s8 + $0x18] sm:$0xff]   ;;  %v799_v7 = vld [vmem:[%s1257_s8 + $0x10] sm:$0xff]  }
  0x6e   : > { %636 = vmatpush3.bf16.msra.mxu0 %v794_v1  ;;  %v802_v5 = vld [vmem:[%s229_s23] sm:$0xff]   ;;  %v800_v8 = vld [vmem:[%s1257_s8 + $0x8] sm:$0xff]  }
  0x6f   : > { %637 = vmatprep.subr.bf16.mxu0 %v795_v2  ;;  %651 = vmatprep.mubr.bf16.mxu0 %v802_v5  ;;  %v801_v9 = vld [vmem:[%s1257_s8] sm:$0xff]   ;;  %v803_v10 = vld [vmem:[%s229_s23 + $0x8] sm:$0xff]  }
  0x71   : > { %v284_v13 = vld [vmem:[#allocation2 + $0x10] sm:$0xff]  ;;  %v285_v19 = vld [vmem:[#allocation2] sm:$0xff] }
  0x72   : > { %638 = vmatpush3.bf16.msra.mxu0 %v795_v2  ;;  %v286_v11 = vld [vmem:[#allocation2 + $0x18] sm:$0xff]  ;;  %v287_v16 = vld [vmem:[#allocation2 + $0x8] sm:$0xff]  ;;  %p618_p4 = scmp.ne.s32.totalorder %s1426_s26, 3 }
  0x73   : > { %639 = vmatprep.subr.bf16.mxu0 %v796_v3 }
  0x76   : > { %640 = vmatpush3.bf16.msra.mxu0 %v796_v3 }
  0x77   : > { %641 = vmatprep.subr.bf16.mxu0 %v797_v4 }
  0x7a   : > { %642 = vmatpush3.bf16.msra.mxu0 %v797_v4 }
  0x7b   : > { %643 = vmatprep.subr.bf16.mxu0 %v798_v6 }
  0x7e   : > { %644 = vmatpush3.bf16.msra.mxu0 %v798_v6 }
  0x7f   : > { %645 = vmatprep.subr.bf16.mxu0 %v799_v7 }
  0x82   : > { %646 = vmatpush3.bf16.msra.mxu0 %v799_v7 }
  0x83   : > { %647 = vmatprep.subr.bf16.mxu0 %v800_v8 }
  0x86   : > { %648 = vmatpush3.bf16.msra.mxu0 %v800_v8 }
  0x87   : > { %649 = vmatprep.subr.bf16.mxu0 %v801_v9 }
  0x8a   : > { %650 = vmatpush3.bf16.msra.mxu0 %v801_v9 }
  0x8d   : > { %652 = vmatmul.mubr.bf16.vlgmr.msra.gmra.mxu0 %v803_v10 }
 0x14d   : > { %v653_v12 = vpop.f32.mrf.mxu0 }
 0x14e   : > { %v419_v14 = vadd.f32 %v653_v12, %v286_v11 }
 0x14f   : > { %v402_v15 = vpop.f32.mrf.mxu0 }
 0x150   : > { %423 = vst [vmem:[#allocation2 + $0x18] sm:$0xff] %v419_v14  ;;  %v417_v17 = vadd.f32 %v402_v15, %v284_v13 }
 0x151   : > { %v654_v18 = vpop.f32.mrf.mxu0 }
 0x152   : > { %421 = vst [vmem:[#allocation2 + $0x10] sm:$0xff] %v417_v17  ;;  %v420_v20 = vadd.f32 %v654_v18, %v287_v16  ;;  %428 = sbr.rel (%p618_p4) target bundleno = 355 (0x163), region = 48 }
 0x153   : > { %v405_v21 = vpop.f32.mrf.mxu0 }
 0x154   : > { %424 = vst [vmem:[#allocation2 + $0x8] sm:$0xff] %v420_v20  ;;  %v418_v22 = vadd.f32 %v405_v21, %v285_v19 }
 0x156   : > { %422 = vst [vmem:[#allocation2] sm:$0xff] %v418_v22 }
 0x157   : > { %v619_v24 = vld [vmem:[%s273_s3] ss:$0 sm:$0xff]  ;;  %v431_v28 = vld [vmem:[#allocation2 + $0x18] sm:$0xff] }
 0x158   : > { %v442_v30 = vadd.f32 %v619_v24, %v431_v28 }
 0x159   : > { %v429_v23 = vld [vmem:[#allocation2 + $0x10] sm:$0xff] }
 0x15a   : > { %v440_v26 = vadd.f32 %v619_v24, %v429_v23  ;;  %v446_v34 = vmax.f32 %v442_v30, 0.0 }
 0x15b   : > { %v432_v29 = vld [vmem:[#allocation2 + $0x8] sm:$0xff] }
 0x15c   : > { %v443_v31 = vadd.f32 %v619_v24, %v432_v29  ;;  %v444_v32 = vmax.f32 %v440_v26, 0.0  ;;  %450 = vst [vmem:[%s1274_s21 + $0x10] sm:$0xff] %v446_v34 }
 0x15d   : > { %v430_v25 = vld [vmem:[#allocation2] sm:$0xff] }
 0x15e   : > { %v441_v27 = vadd.f32 %v619_v24, %v430_v25  ;;  %v447_v35 = vmax.f32 %v443_v31, 0.0  ;;  %448 = vst [vmem:[%s1274_s21] sm:$0xff] %v444_v32 }
 0x160   : > { %v445_v33 = vmax.f32 %v441_v27, 0.0  ;;  %451 = vst [vmem:[%s1274_s21 + $0x18] sm:$0xff] %v447_v35 }
 0x162   : > { %449 = vst [vmem:[%s1274_s21 + $0x8] sm:$0xff] %v445_v33 }
 0x163 PF: > { %s621_s18 = sshll.u32 %s996_s22, 7  ;;  %s1428_s8 = sld [smem:[#allocation20_spill]] }
 0x164   : > { %s468_s20 = sshll.u32 %s1274_s21, 4  ;;  %s1310_s30 = scalar_lea.sflag [#allocation5], %s266_s2  ;;  %s1306_s20 = int_to_ptr.vmem [resolvable:$true] %s468_s20 }
 0x165   : > { %s860_s9 = scalar_lea.vmem %s1306_s20, 512  ;;  %s1017_s22 = smov [#allocation8]  }
 0x166   : > { %p861_p5 = scmp.ne.s32.totalorder %s1306_s20, %s860_s9  ;;  %s864_s0 = sshll.u32 %s1017_s22, 4  ;;  %s865_s0 = int_to_ptr.vmem [resolvable:$false] %s864_s0 }
 0x167   : > { %s866_s3 = scalar_lea.vmem %s865_s0, 1024  ;;  %p867_p12 = scmp.lt.s32.totalorder %s1306_s20, %s865_s0 }
 0x168   : > { %p862_p7 = pnand %p861_p5, %p1212_p13  ;;  %p868_p0 = scmp.lt.s32.totalorder %s866_s3, %s860_s9 }
 0x169   : > { %s1303_s7 = scalar_lea.hbm %s1428_s8, %s621_s18 }
 0x16a   : > { %p863_p10 = pneg %p862_p7  ;;  %p869_p6 = por %p868_p0, %p867_p12 }
 0x16c   : > { %p870_p2 = pnand %p869_p6, %p863_p10 }
 0x16e   : > { %873 = shalt.err (!%p870_p2)
}
 0x16f   : > { %s874_s2 = scalar_lea.hbm %s1303_s7, 512  ;;  %s878_s26 = scalar_lea.hbm %s1428_s8, 1024 }
 0x170   : > { %p875_p3 = scmp.ne.s32.totalorder %s1303_s7, %s874_s2  ;;  %p879_p8 = scmp.lt.s32.totalorder %s1303_s7, %s1428_s8 }
 0x171   : > { %p880_p1 = scmp.lt.s32.totalorder %s878_s26, %s874_s2 }
 0x172   : > { %p876_p11 = pnand %p875_p3, %p1212_p13 }
 0x173   : > { %p881_p4 = por %p880_p1, %p879_p8 }
 0x174   : > { %p877_p9 = pneg %p876_p11 }
 0x176   : > { %p882_p5 = pnand %p881_p4, %p877_p9 }
 0x178   : > { %885 = shalt.err (!%p882_p5)
}
 0x179   : > { %s1018_s23 = smov 128   ;;  %s1019_s18 = smov 256  }
 0x17a   : > { %s1020_s11 = smov 8  }
 0x17b   : > { %659 = dma.vmem_to_hbm [thread:$0]  (%p1212_p13), %s1306_s20, 512, %s1303_s7, %s1310_s30, %s1018_s23, %s1019_s18, %s1020_s11  }
 0x17c PF: > { %p673_p7 = scmp.ge.s32.totalorder %s1008_s25, 2  ;;  %s483_s15 = sand.u32 1, %s956_s12  }
 0x17d   : > { %p1429_p10 = scmp.ne.s32.totalorder %s1419_s10, 0  ;;  %s484_s9 = scalar_lea.sflag [#allocation5], %s483_s15 }
 0x17f   : > { %p669_p12 = pnand %p673_p7, %p1429_p10 }
 0x181   : > { %p670_p0 = pneg %p669_p12 }
 0x183   : > { %951 = dma.done.wait (%p670_p0), %s484_s9, 512  }
 0x184   : > { %953 = vsyncadd (%p670_p0), %s484_s9, 4294966784  ;;  %s22_s25 = sadd.s32 1, %s1008_s25   ;;  %s1431_s5 = sld [smem:[#allocation12_spill]] }
 0x185   : > { %p1338_p6 = scmp.ge.s32.totalorder %s22_s25, 10   ;;  %s1432_s20 = sld [smem:[#allocation16_spill]] }
 0x186   : > { %s1433_s21 = sld [smem:[#allocation14_spill]]  ;;  %s1437_s12 = smov %s960_s13 }
 0x187   : > { %s1434_s23 = sld [smem:[#allocation15_spill]]  ;;  %s1438_s13 = smov %s964_s14 }
 0x188   : > { %s1435_s10 = sld [smem:[#allocation17_spill]]  ;;  %s1439_s14 = smov %s1217_s29 }
 0x189   : > { %s1440_s15 = smov %s972_s16  ;;  %s1441_s16 = smov %s976_s17 }
 0x18a   : > { %s1442_s17 = smov %s1220_s27  ;;  %s1443_s18 = smov %s984_s19 }
 0x18b   : > { %s1444_s19 = smov %s1431_s5  ;;  %s1445_s22 = smov %s1004_s24 }
 0x18c   :  { %21 = sbr.rel (!%p1338_p6) target bundleno = 16 (0x10), region = 101 }
 0x18e   : > { %s1446_s24 = smov %s1435_s10 }
 0x191   :  { %489 = vsyncpa [#allocation4], 1 }
 0x192   :  { %491 = vsyncpa [#allocation4 + $0x1], 1 }
 0x193   :  { %492 = vsyncpa [#allocation7], 1 }
 0x194   :  { %494 = vsyncpa [#allocation7 + $0x1], 1 }
 0x195   :  { %495 = vsyncpa [#allocation5], 1 }
 0x196   :  { %497 = vsyncpa [#allocation5 + $0x1], 1 }

</bundles_post_ra>
